<compile_context>
chip_gen: v7x
topology: tpu7x:2x2x1
jax: 0.10.0
libtpu: 0.0.40
codegen_flags: <defaults>
</compile_context>

<pallas_src>
import functools

import jax
import jax.numpy as jnp
import numpy as np
from jax import lax
from jax.experimental import pallas as pl
from jax.experimental.pallas import tpu as pltpu


def residual_block_kernel(x_ref, w1_ref, w2_ref, b1_ref, b2_ref, out_ref,
                          *, K, P):
  """Whole ResidualBlock forward for one batch element (one grid step).

  x_ref  : (1, C, L)     input block for this batch element
  w1_ref : (C, K*C)      conv1 weight, taps stacked along the contraction dim,
                         BN1 scale pre-folded per output channel
  w2_ref : (C, K*C)      conv2 weight (BN2 scale pre-folded)
  b1_ref : (C, 1)        folded BN1 bias
  b2_ref : (C, 1)        folded BN2 bias
  out_ref: (1, C, L)     output block
  """
  x = x_ref[0].astype(jnp.float32)              # (C, L)
  C, L = x.shape

  def tap_stack(v):
    # Build the (K*C, L) stacked-shift operand so that one matmul computes
    # the full K-tap convolution: block k rows give v_padded[:, l + k].
    zcol = jnp.zeros((C, P), jnp.float32)
    vpad = jnp.concatenate([zcol, v, zcol], axis=1)        # (C, L + 2P)
    return jnp.concatenate([vpad[:, k:k + L] for k in range(K)], axis=0)

  # Hoisted once per grid step (no per-batch unroll anymore).
  b1 = b1_ref[...]                              # (C, 1)
  b2 = b2_ref[...]                              # (C, 1)

  # ---- conv1 (single stacked matmul) + folded-BN1 bias + ReLU ----
  h = jnp.dot(w1_ref[...], tap_stack(x),
              preferred_element_type=jnp.float32) + b1
  h = jnp.maximum(h, 0.0)                       # dropout1 = identity (eval)

  # ---- conv2 (single stacked matmul) + folded-BN2 bias + residual + ReLU ----
  h2 = jnp.dot(w2_ref[...], tap_stack(h),
               preferred_element_type=jnp.float32) + b2
  out = jnp.maximum(h2 + x, 0.0)                # dropout2 = identity (eval)
  out_ref[0] = out.astype(out_ref.dtype)


def residual_block_pallas(x, w1, w2, bn1, bn2, *, eps=1e-5):
  """x: (N, C, L) f32. w*: (C_out, C_in, K) PyTorch OIK layout. bn*: dicts."""
  N, C, L = x.shape
  C_out, C_in, K = w1.shape
  assert C_out == C and C_in == C, "residual_connection=None needs in_ch == out_ch"
  P = K // 2

  def fold(w, bn):
    # Fold eval-mode BatchNorm into the conv weight (per-out-channel scale)
    # and a per-channel bias; then stack the K taps along the contraction dim.
    s = bn["gamma"] / jnp.sqrt(bn["var"] + eps)            # (C,)
    b = (bn["beta"] - bn["mean"] * s).reshape(C, 1)
    w_s = w * s[:, None, None]                             # (O, I, K)
    # (O, I, K) -> (O, K, I) -> (O, K*I): block k along axis 1 is w_s[:, :, k].
    w_stk = jnp.transpose(w_s, (0, 2, 1)).reshape(C, K * C)
    return w_stk.astype(jnp.float32), b.astype(jnp.float32)

  w1s, b1 = fold(w1, bn1)
  w2s, b2 = fold(w2, bn2)

  kernel = functools.partial(residual_block_kernel, K=K, P=P)

  return pl.pallas_call(
      kernel,
      out_shape=jax.ShapeDtypeStruct((N, C, L), x.dtype),
      grid=(N,),
      in_specs=[
          pl.BlockSpec((1, C, L), lambda n: (n, 0, 0)),    # x (one batch elem)
          pl.BlockSpec((C, K * C), lambda n: (0, 0)),      # w1 (tap-stacked)
          pl.BlockSpec((C, K * C), lambda n: (0, 0)),      # w2 (tap-stacked)
          pl.BlockSpec((C, 1), lambda n: (0, 0)),          # bn1 folded bias
          pl.BlockSpec((C, 1), lambda n: (0, 0)),          # bn2 folded bias
      ],
      out_specs=pl.BlockSpec((1, C, L), lambda n: (n, 0, 0)),
      compiler_params=pltpu.CompilerParams(
          dimension_semantics=("parallel",)),
  )(x, w1s, w2s, b1, b2)


def residual_block_ref(x, w1, w2, bn1, bn2, *, eps=1e-5):
  """Pure-JAX reference (matches PyTorch eval-mode forward)."""
  def conv1d(inp, w):
    return lax.conv_general_dilated(
        inp, w, window_strides=(1,), padding=[(w.shape[-1] // 2,) * 2],
        dimension_numbers=("NCH", "OIH", "NCH"))

  def bn(h, p):
    scale = p["gamma"] / jnp.sqrt(p["var"] + eps)
    bias = p["beta"] - p["mean"] * scale
    return h * scale[None, :, None] + bias[None, :, None]

  h = jax.nn.relu(bn(conv1d(x, w1), bn1))
  h = bn(conv1d(h, w2), bn2)
  return jax.nn.relu(h + x)


if __name__ == "__main__":
  N, C, L, K = 2, 4, 16, 3   # batch, in_ch == out_ch, sequence length, kernel

  key = jax.random.PRNGKey(0)
  kx, kw1, kw2, kg1, kb1, km1, kv1, kg2, kb2, km2, kv2 = jax.random.split(key, 11)

  x = jax.random.normal(kx, (N, C, L), dtype=jnp.float32)
  w1 = jax.random.normal(kw1, (C, C, K), dtype=jnp.float32) * 0.3  # (out, in, k)
  w2 = jax.random.normal(kw2, (C, C, K), dtype=jnp.float32) * 0.3

  bn1 = dict(gamma=1.0 + 0.1 * jax.random.normal(kg1, (C,), jnp.float32),
             beta=0.1 * jax.random.normal(kb1, (C,), jnp.float32),
             mean=0.1 * jax.random.normal(km1, (C,), jnp.float32),
             var=jax.random.uniform(kv1, (C,), jnp.float32, 0.5, 1.5))
  bn2 = dict(gamma=1.0 + 0.1 * jax.random.normal(kg2, (C,), jnp.float32),
             beta=0.1 * jax.random.normal(kb2, (C,), jnp.float32),
             mean=0.1 * jax.random.normal(km2, (C,), jnp.float32),
             var=jax.random.uniform(kv2, (C,), jnp.float32, 0.5, 1.5))

  out = residual_block_pallas(x, w1, w2, bn1, bn2)
  out = jax.block_until_ready(out)

  ref = jax.block_until_ready(residual_block_ref(x, w1, w2, bn1, bn2))
  np.testing.assert_allclose(np.asarray(out), np.asarray(ref),
                             rtol=1e-4, atol=1e-4)

  print("KERNEL_OK")
</pallas_src>

<mosaic_0001>
module attributes {stable_mosaic.version = 11 : i64} {
  func.func @residual_block_kernel(%arg0: i32, %arg1: memref<1x4x16xf32, #tpu.memory_space<vmem>>, %arg2: memref<4x12xf32, #tpu.memory_space<vmem>>, %arg3: memref<4x12xf32, #tpu.memory_space<vmem>>, %arg4: memref<4x1xf32, #tpu.memory_space<vmem>>, %arg5: memref<4x1xf32, #tpu.memory_space<vmem>>, %arg6: memref<1x4x16xf32, #tpu.memory_space<vmem>>) attributes {dimension_semantics = [#tpu.dimension_semantics<parallel>], iteration_bounds = array<i64: 2>, scalar_prefetch = 0 : i64, scratch_operands = 0 : i64, tpu.core_type = #tpu.core_type<tc>, window_params = [{transform_indices = @transform_0, window_bounds = array<i64: 1, 4, 16>}, {pipeline_mode = #tpu.pipeline_mode<synchronous>, transform_indices = @transform_1, window_bounds = array<i64: 4, 12>}, {pipeline_mode = #tpu.pipeline_mode<synchronous>, transform_indices = @transform_2, window_bounds = array<i64: 4, 12>}, {pipeline_mode = #tpu.pipeline_mode<synchronous>, transform_indices = @transform_3, window_bounds = array<i64: 4, 1>}, {pipeline_mode = #tpu.pipeline_mode<synchronous>, transform_indices = @transform_4, window_bounds = array<i64: 4, 1>}, {transform_indices = @transform_5, window_bounds = array<i64: 1, 4, 16>}]} {
    %c0 = arith.constant 0 : index
    %c0_0 = arith.constant 0 : index
    %c0_1 = arith.constant 0 : index
    %0 = vector.load %arg1[%c0, %c0_0, %c0_1] : memref<1x4x16xf32, #tpu.memory_space<vmem>>, vector<1x4x16xf32>
    %1 = vector.shape_cast %0 : vector<1x4x16xf32> to vector<4x16xf32>
    %c0_2 = arith.constant 0 : index
    %c0_3 = arith.constant 0 : index
    %2 = vector.load %arg4[%c0_2, %c0_3] : memref<4x1xf32, #tpu.memory_space<vmem>>, vector<4x1xf32>
    %c0_4 = arith.constant 0 : index
    %c0_5 = arith.constant 0 : index
    %3 = vector.load %arg5[%c0_4, %c0_5] : memref<4x1xf32, #tpu.memory_space<vmem>>, vector<4x1xf32>
    %c0_6 = arith.constant 0 : index
    %c0_7 = arith.constant 0 : index
    %4 = vector.load %arg2[%c0_6, %c0_7] : memref<4x12xf32, #tpu.memory_space<vmem>>, vector<4x12xf32>
    %cst = arith.constant 0.000000e+00 : f32
    %5 = vector.broadcast %cst : f32 to vector<4x1xf32>
    %6 = tpu.concatenate %5, %1, %5 in 1 : vector<4x1xf32>, vector<4x16xf32>, vector<4x1xf32> -> vector<4x18xf32>
    %7 = vector.extract_strided_slice %6 {offsets = [0, 0], sizes = [4, 16], strides = [1, 1]} : vector<4x18xf32> to vector<4x16xf32>
    %8 = vector.extract_strided_slice %6 {offsets = [0, 1], sizes = [4, 16], strides = [1, 1]} : vector<4x18xf32> to vector<4x16xf32>
    %9 = vector.extract_strided_slice %6 {offsets = [0, 2], sizes = [4, 16], strides = [1, 1]} : vector<4x18xf32> to vector<4x16xf32>
    %10 = tpu.concatenate %7, %8, %9 in 0 : vector<4x16xf32>, vector<4x16xf32>, vector<4x16xf32> -> vector<12x16xf32>
    %cst_8 = arith.constant dense<0.000000e+00> : vector<4x16xf32>
    %11 = tpu.matmul %4, %10, %cst_8 {dimension_numbers = #tpu.dot_dimension_numbers<[1], [0], [0], [1], [0, 0, 1, 1], [], []>} : vector<4x12xf32>, vector<12x16xf32>, vector<4x16xf32> -> vector<4x16xf32>
    %12 = vector.broadcast %2 : vector<4x1xf32> to vector<4x16xf32>
    %13 = arith.addf %11, %12 : vector<4x16xf32>
    %cst_9 = arith.constant 0.000000e+00 : f32
    %14 = vector.broadcast %cst_9 : f32 to vector<4x16xf32>
    %15 = arith.maximumf %13, %14 : vector<4x16xf32>
    %c0_10 = arith.constant 0 : index
    %c0_11 = arith.constant 0 : index
    %16 = vector.load %arg3[%c0_10, %c0_11] : memref<4x12xf32, #tpu.memory_space<vmem>>, vector<4x12xf32>
    %cst_12 = arith.constant 0.000000e+00 : f32
    %17 = vector.broadcast %cst_12 : f32 to vector<4x1xf32>
    %18 = tpu.concatenate %17, %15, %17 in 1 : vector<4x1xf32>, vector<4x16xf32>, vector<4x1xf32> -> vector<4x18xf32>
    %19 = vector.extract_strided_slice %18 {offsets = [0, 0], sizes = [4, 16], strides = [1, 1]} : vector<4x18xf32> to vector<4x16xf32>
    %20 = vector.extract_strided_slice %18 {offsets = [0, 1], sizes = [4, 16], strides = [1, 1]} : vector<4x18xf32> to vector<4x16xf32>
    %21 = vector.extract_strided_slice %18 {offsets = [0, 2], sizes = [4, 16], strides = [1, 1]} : vector<4x18xf32> to vector<4x16xf32>
    %22 = tpu.concatenate %19, %20, %21 in 0 : vector<4x16xf32>, vector<4x16xf32>, vector<4x16xf32> -> vector<12x16xf32>
    %cst_13 = arith.constant dense<0.000000e+00> : vector<4x16xf32>
    %23 = tpu.matmul %16, %22, %cst_13 {dimension_numbers = #tpu.dot_dimension_numbers<[1], [0], [0], [1], [0, 0, 1, 1], [], []>} : vector<4x12xf32>, vector<12x16xf32>, vector<4x16xf32> -> vector<4x16xf32>
    %24 = vector.broadcast %3 : vector<4x1xf32> to vector<4x16xf32>
    %25 = arith.addf %23, %24 : vector<4x16xf32>
    %26 = arith.addf %25, %1 : vector<4x16xf32>
    %cst_14 = arith.constant 0.000000e+00 : f32
    %27 = vector.broadcast %cst_14 : f32 to vector<4x16xf32>
    %28 = arith.maximumf %26, %27 : vector<4x16xf32>
    %c0_15 = arith.constant 0 : index
    %c0_16 = arith.constant 0 : index
    %c0_17 = arith.constant 0 : index
    %29 = vector.load %arg6[%c0_15, %c0_16, %c0_17] : memref<1x4x16xf32, #tpu.memory_space<vmem>>, vector<1x4x16xf32>
    %30 = vector.shape_cast %29 : vector<1x4x16xf32> to vector<4x16xf32>
    %31 = vector.shape_cast %28 : vector<4x16xf32> to vector<1x4x16xf32>
    tpu.vector_store %arg6[%c0_15, %c0_16, %c0_17], %31 {strides = array<i32>} : memref<1x4x16xf32, #tpu.memory_space<vmem>>, vector<1x4x16xf32>,
    return
  }
  func.func @transform_0(%arg0: i32) -> (i32, i32, i32) {
    %c0_i32 = arith.constant 0 : i32
    %c0_i32_0 = arith.constant 0 : i32
    %c0_i32_1 = arith.constant 0 : i32
    return %arg0, %c0_i32, %c0_i32_0 : i32, i32, i32
  }
  func.func @transform_1(%arg0: i32) -> (i32, i32) {
    %c0_i32 = arith.constant 0 : i32
    %c0_i32_0 = arith.constant 0 : i32
    %c0_i32_1 = arith.constant 0 : i32
    return %c0_i32, %c0_i32_0 : i32, i32
  }
  func.func @transform_2(%arg0: i32) -> (i32, i32) {
    %c0_i32 = arith.constant 0 : i32
    %c0_i32_0 = arith.constant 0 : i32
    %c0_i32_1 = arith.constant 0 : i32
    return %c0_i32, %c0_i32_0 : i32, i32
  }
  func.func @transform_3(%arg0: i32) -> (i32, i32) {
    %c0_i32 = arith.constant 0 : i32
    %c0_i32_0 = arith.constant 0 : i32
    %c0_i32_1 = arith.constant 0 : i32
    return %c0_i32, %c0_i32_0 : i32, i32
  }
  func.func @transform_4(%arg0: i32) -> (i32, i32) {
    %c0_i32 = arith.constant 0 : i32
    %c0_i32_0 = arith.constant 0 : i32
    %c0_i32_1 = arith.constant 0 : i32
    return %c0_i32, %c0_i32_0 : i32, i32
  }
  func.func @transform_5(%arg0: i32) -> (i32, i32, i32) {
    %c0_i32 = arith.constant 0 : i32
    %c0_i32_0 = arith.constant 0 : i32
    %c0_i32_1 = arith.constant 0 : i32
    return %arg0, %c0_i32, %c0_i32_0 : i32, i32, i32
  }
}

</mosaic_0001>

<bundles_post_ra>
// kernel: tpu_custom_call.1
= control target key start
LH: loop header
LB: loop body
LE: loop exit
PB: predicated region body
PF: predicated region fallthrough
CT: control target
= control target key end

     0   :  { %10 = vsyncpa [#allocation3], 0  ;;  %s824_s0 = inlined_call_operand.vmem [shape: f32[2,4,16], index: 0, kind: input, shape index: {}]   ;;  %s825_s1 = inlined_call_operand.vmem [shape: f32[4,12], index: 1, kind: input, shape index: {}]   ;;  %s826_s2 = inlined_call_operand.vmem [shape: f32[4,12], index: 2, kind: input, shape index: {}]   ;;  %s827_s3 = inlined_call_operand.vmem [shape: f32[4,1], index: 3, kind: input, shape index: {}]   ;;  %s828_s4 = inlined_call_operand.vmem [shape: f32[4,1], index: 4, kind: input, shape index: {}]   ;;  %s829_s5 = inlined_call_operand.hbm [shape: f32[2,4,16], index: 5, kind: output, shape index: {}]  }
   0x1   :  { %12 = vsyncpa [#allocation3 + $0x1], 0  ;;  %s689_s18 = smov 0   ;;  %s691_s19 = smov 0  }
   0x2   :  { %s693_s20 = smov 0   ;;  %s695_s21 = smov 0  }
   0x3 LB: > { %s710_s22 = sadd.s32 4294967295, %s648_s21   ;;  %s495_s23 = sadd.s32 4294967294, %s648_s21   ;;  %s648_s21 = sphi %s695_s21, %s837_s21   ;;  %s644_s20 = sphi %s693_s20, %s836_s20   ;;  %s640_s19 = sphi %s691_s19, %s835_s19   ;;  %s636_s18 = sphi %s689_s18, %s834_s18  }
   0x4   : > { %s714_s24 = sadd.s32 1, %s648_s21   ;;  %s135_s25 = sadd.s32 1, %s644_s20 }
   0x5   : > { %s132_s26 = ssub.s32 %s648_s21, %s714_s24  ;;  %p145_p0 = scmp.ne.s32.totalorder %s644_s20, %s640_s19 }
   0x6   : > { %p133_p1 = scmp.eq.s32.totalorder %s132_s26, 0  ;;  %p146_p2 = scmp.eq.s32.totalorder %s710_s22, 1 }
   0x7   : > { %p151_p3 = scmp.ne.s32.totalorder %s640_s19, %s636_s18  ;;  %p152_p4 = scmp.eq.s32.totalorder %s495_s23, 1 }
   0x8   : > { %s725_s27 = scalar_select %p133_p1, %s644_s20, %s135_s25  }
   0x9   : > { %p727_p5 = por %p146_p2, %p145_p0  ;;  %p731_p6 = por %p152_p4, %p151_p3 }
   0xa   : > { %p498_p7 = scmp.ge.s32.totalorder %s648_s21, 1  ;;  %p189_p8 = scmp.lt.s32.totalorder %s648_s21, 3 }
   0xc   : > { %p190_p9 = pnand %p498_p7, %p189_p8 }
   0xd   : > { %p216_p10 = scmp.lt.s32.totalorder (!%p190_p9), %s710_s22, 1  ;;  %s650_s10 = smov (!%p190_p9), 1   ;;  %v651_v1 = vmov (!%p190_p9), 0.0|0.0   ;;  %vm652_vm0 = vmmov (!%p190_p9), 0   ;;  %v653_v2 = vmov (!%p190_p9), 0.0   ;;  %vm228_vm1 = vcmask (!%p190_p9), 7168  }
   0xe   : > { %193 = sbr.rel (%p190_p9) target bundleno = 954 (0x3ba), region = 40  ;;  %529 = vmatprep.subr.bf16.mxu0 (!%p190_p9), %v651_v1  ;;  %533 = vmatprep.subr.bf16.mxu1 (!%p190_p9), %v651_v1  ;;  %vm230_vm2 = vcmask (!%p190_p9), 138240   ;;  %v654_v3 = vmov (!%p190_p9), 0   ;;  %s655_s11 = smov (!%p190_p9), 126   ;;  %v221_v8 = vld [vmem:[%s827_s3] sm:$0xf] (!%p190_p9) }
   0xf   : > { %519 = vmatprep.mubr.msk.f32.mxu0 (!%p190_p9), %vm652_vm0, %v653_v2  ;;  %526 = vmatprep.mubr.msk.f32.mxu1 (!%p190_p9), %vm652_vm0, %v653_v2  ;;  %s656_s14 = smov (!%p190_p9), 127   ;;  %vm239_vm3 = vcmask (!%p190_p9), 1043456   ;;  %vm657_vm4 = vmmov (!%p190_p9), 1   ;;  %v223_v14 = vld [vmem:[%s825_s1] sm:$0xf] (!%p190_p9)  ;;  %vm246_vm6 = vcmask (!%p190_p9), 97280  }
  0x10   : > { %584 = vset.pattern.permute.xlu1 (!%p190_p9), %v654_v3  ;;  %585 = vset.pattern.permute.xlu0 (!%p190_p9), %v654_v3  ;;  %vm753_vm5 = vmpackc.low (!%p190_p9), %vm239_vm3, %vm657_vm4  ;;  %v222_v24 = vld [vmem:[%s828_s4] sm:$0xf] (!%p190_p9)  ;;  %s506_s7 = sshll.u32 (!%p190_p9), %s710_s22, 6  ;;  %vm420_vm7 = vcmask (!%p190_p9), 125952  }
  0x11   : > { %v323_v29 = vld [vmem:[%s826_s2] sm:$0xf] (!%p190_p9)  ;;  %s782_s12 = scalar_lea.hbm (!%p190_p9), %s829_s5, %s506_s7 }
  0x15   : > { %s217_s30 = scalar_select %p216_p10, %s710_s22, 1 }
  0x16   : > { %s658_s22 = smov [#allocation2]  }
  0x17   : > { %s500_s6 = sshll.u32 %s217_s30, 2  ;;  %s213_s30 = sand.u32 1, %s640_s19  }
  0x18   : > { %s219_s9 = scalar_lea.vmem %s824_s0, %s500_s6  ;;  %s499_s6 = sshll.u32 %s213_s30, 2 }
  0x19   : > { %v742_v0 = vld [vmem:[%s219_s9] sm:$0xf]  ;;  %s215_s8 = scalar_lea.vmem [#allocation2], %s499_s6  ;;  %s423_s13 = scalar_lea.sflag [#allocation3], %s213_s30 }
  0x1a   : > { %225 = vrot.lane.b32.xlu0 %v742_v0, %s650_s10  ;;  %s436_s9 = sshll.u32 %s215_s8, 4  ;;  %s590_s15 = sshll.u32 %s658_s22, 4  ;;  %s784_s9 = int_to_ptr.vmem [resolvable:$true] %s436_s9  ;;  %s591_s15 = int_to_ptr.vmem [resolvable:$false] %s590_s15 }
  0x1b   : > { %s592_s16 = scalar_lea.vmem %s591_s15, 128  ;;  %p593_p0 = scmp.lt.s32.totalorder %s784_s9, %s591_s15 }
  0x8c   : > { %v226_v4 = vpop.permute.xlu0 %225 }
  0x8d   : > { %v229_v5 = vsel %vm228_vm1, 0.0, %v226_v4 }
  0x8e   : > { %v231_v6 = vsel %vm230_vm2, %v229_v5, 0.0 }
  0x8f   : > { %v233_v7 = vrot.slane %v231_v6, 4  ;;  %237 = vrot.lane.b32.xlu1 %v231_v6, %s655_s11 }
  0x91   : > { %234 = vrot.lane.b32.xlu0 %v233_v7, %s656_s14 }
  0x93   : > { %243 = vperm.xlu1 %584, %v221_v8  }
 0x101   : > { %v238_v10 = vpop.permute.xlu1 %237 }
 0x103   : > { %v235_v9 = vpop.permute.xlu0 %234 }
 0x104   : > { %v240_v11 = vsel %vm239_vm3, %v231_v6, %v235_v9 }
 0x105   : > { %v530_v13 = vpack.c.bf16 %v238_v10, %v240_v11 }
 0x107   : > { %532 = vmatpush3.bf16.msk.msra.mxu0 %vm753_vm5, %v530_v13 }
 0x10a   : > { %520 = vmatmul.mubr.msk.f32.vlgmr.msra.gmra.mrb[0].mxu0 %vm246_vm6, %v223_v14 }
 0x112   : > { %v244_v15 = vpop.permute.xlu1 %243 }
 0x1dd   : > { %v318_v16 = vpop.f32.mrb[0].mxu0 }
 0x1de   : > { %v319_v17 = vadd.f32 %v318_v16, %v244_v15  ;;  %v521_v18 = vpop.f32.mrb[1].mxu0 }
 0x1e0   : > { %v322_v19 = vmax.f32 %v319_v17, 0.0 }
 0x1e2   : > { %325 = vrot.lane.b32.xlu0 %v322_v19, %s650_s10 }
 0x254   : > { %v326_v20 = vpop.permute.xlu0 %325 }
 0x255   : > { %v328_v21 = vsel %vm228_vm1, 0.0, %v326_v20 }
 0x256   : > { %v329_v22 = vsel %vm230_vm2, %v328_v21, 0.0 }
 0x257   : > { %v331_v23 = vrot.slane %v329_v22, 4  ;;  %335 = vrot.lane.b32.xlu0 %v329_v22, %s655_s11 }
 0x259   : > { %332 = vrot.lane.b32.xlu1 %v331_v23, %s656_s14  ;;  %s586_s14 = scalar_lea.vmem %s784_s9, 64 }
 0x25a   : > { %p587_p11 = scmp.ne.s32.totalorder %s784_s9, %s586_s14  ;;  %p594_p1 = scmp.lt.s32.totalorder %s592_s16, %s586_s14 }
 0x25c   : > { %p588_p12 = pnand %p587_p11, %p727_p5  ;;  %p595_p2 = por %p594_p1, %p593_p0 }
 0x25d   : > { %340 = vperm.xlu1 %584, %v222_v24  }
 0x25e   : > { %p589_p13 = pneg %p588_p12 }
 0x260   : > { %p596_p3 = pnand %p595_p2, %p589_p13 }
 0x2c9   : > { %v336_v26 = vpop.permute.xlu0 %335 }
 0x2cb   : > { %v333_v25 = vpop.permute.xlu1 %332 }
 0x2cc   : > { %v337_v27 = vsel %vm239_vm3, %v329_v22, %v333_v25 }
 0x2cd   : > { %v534_v28 = vpack.c.bf16 %v336_v26, %v337_v27 }
 0x2cf   : > { %536 = vmatpush3.bf16.msk.msra.mxu1 %vm753_vm5, %v534_v28 }
 0x2d2   : > { %527 = vmatmul.mubr.msk.f32.vlgmr.msra.gmra.mrb[0].mxu1 %vm246_vm6, %v323_v29 }
 0x2dc   : > { %v341_v30 = vpop.permute.xlu1 %340 }
 0x3a5   : > { %v414_v31 = vpop.f32.mrb[0].mxu1 }
 0x3a6   : > { %v415_v32 = vadd.f32 %v414_v31, %v341_v30  ;;  %v528_v33 = vpop.f32.mrb[1].mxu1 }
 0x3a8   : > { %v418_v34 = vadd.f32 %v415_v32, %v742_v0 }
 0x3aa   : > { %v419_v35 = vmax.f32 %v418_v34, 0.0 }
 0x3ac   : > { %421 = vst.msk [vmem:[%s215_s8] sm:$0xf] %vm420_vm7, %v419_v35 }
 0x3ad   : > { %599 = shalt.err (!%p596_p3)
}
 0x3ae   : > { %s600_s17 = scalar_lea.hbm %s782_s12, 64  ;;  %s604_s26 = scalar_lea.hbm %s829_s5, 128 }
 0x3af   : > { %p601_p4 = scmp.ne.s32.totalorder %s782_s12, %s600_s17  ;;  %p605_p9 = scmp.lt.u32.totalorder %s782_s12, %s829_s5 }
 0x3b0   : > { %p606_p10 = scmp.lt.u32.totalorder %s604_s26, %s600_s17  ;;  %p608_p12 = scmp.lt.u32.totalorder %s600_s17, %s782_s12 }
 0x3b1   : > { %p602_p7 = pnand %p601_p4, %p727_p5 }
 0x3b2   : > { %p607_p11 = por %p606_p10, %p605_p9 }
 0x3b3   : > { %p603_p8 = pneg %p602_p7 }
 0x3b4   : > { %p609_p13 = por %p608_p12, %p607_p11 }
 0x3b6   : > { %p610_p0 = pnand %p609_p13, %p603_p8 }
 0x3b8   : > { %613 = shalt.err (!%p610_p0)
}
 0x3b9   : > { %537 = dma.vmem_to_hbm [thread:$0]  (%p727_p5), %s784_s9, 64, %s782_s12, %s423_s13  }
 0x3ba PF: > { %p543_p1 = scmp.ge.s32.totalorder %s648_s21, 2  ;;  %s448_s7 = sand.u32 1, %s636_s18  }
 0x3bb   : > { %s449_s8 = scalar_lea.sflag [#allocation3], %s448_s7 }
 0x3bc   : > { %p540_p2 = pnand %p543_p1, %p731_p6 }
 0x3be   : > { %631 = dma.done.wait (!%p540_p2), %s449_s8, 64  }
 0x3bf   : > { %633 = vsyncadd (!%p540_p2), %s449_s8, 4294967232  ;;  %p15_p3 = scmp.ge.s32.totalorder %s714_s24, 4   ;;  %s834_s18 = smov %s640_s19 }
 0x3c0   : > { %s835_s19 = smov %s644_s20  ;;  %s836_s20 = smov %s725_s27 }
 0x3c1   : > { %s837_s21 = smov %s714_s24  ;;  %17 = sbr.rel (!%p15_p3) target bundleno = 3 (0x3), region = 75 }
 0x3c8   :  { %454 = vsyncpa [#allocation3], 1 }
 0x3c9   :  { %456 = vsyncpa [#allocation3 + $0x1], 1 }

</bundles_post_ra>
